<compile_context>
chip_gen: v7x
topology: tpu7x:2x2x1
jax: 0.10.0
libtpu: 0.0.40
codegen_flags: <defaults>
</compile_context>

<pallas_src>
import math

import jax
import jax.numpy as jnp
from jax import lax
from jax.experimental import pallas as pl
from jax.experimental.pallas import tpu as pltpu


# ----------------------------------------------------------------------------
# Kernel body: one DFFLayer for one batch element; hidden state carried in
# the resident output block across the layer grid axis.
# ----------------------------------------------------------------------------
def make_dff_encoder_kernel(num_heads: int, head_size: int, hidden: int, eps: float):
    scale = 1.0 / math.sqrt(head_size)
    H = hidden
    trans_b = (((1,), (1,)), ((), ()))  # contract last dims: A @ B^T on the MXU

    def kernel(x_ref, g1_ref, b1_ref, wqkv_ref, bqkv_ref, wo_ref, bo_ref,
               g2_ref, b2_ref, wi_ref, bi_ref, wout_ref, bout_ref,
               out_ref, ctx_ref):
        layer = pl.program_id(1)

        # Seed the layer carry from the encoder input on the first layer.
        @pl.when(layer == 0)
        def _():
            out_ref[...] = x_ref[...]

        cdt = x_ref.dtype                        # matmul operand dtype (no force-fp32)
        x_f32 = out_ref[...].astype(jnp.float32)  # residual stream kept fp32

        def layer_norm(t_f32, g_ref, b_ref):
            mu = jnp.mean(t_f32, axis=-1, keepdims=True)
            tc = t_f32 - mu
            var = jnp.mean(tc * tc, axis=-1, keepdims=True)
            return (tc * lax.rsqrt(var + eps)
                    * g_ref[...].astype(jnp.float32)
                    + b_ref[...].astype(jnp.float32))

        # ---- layernorm_before ----
        xn = layer_norm(x_f32, g1_ref, b1_ref).astype(cdt)

        # ---- fused QKV projection: one wide (S,H) x (H,3H) MXU pass ----
        qkv = jnp.dot(xn, wqkv_ref[...], preferred_element_type=jnp.float32)
        qkv = qkv + bqkv_ref[...].astype(jnp.float32)
        q = (qkv[:, 0 * H:1 * H] * scale).astype(cdt)   # scale folded into q
        k = qkv[:, 1 * H:2 * H].astype(cdt)
        v = qkv[:, 2 * H:3 * H].astype(cdt)

        # ---- per-head scaled-dot-product attention ----
        # Static loop over heads; each head's context is written straight into
        # the (S, H) fp32 VMEM scratch (no lane-concatenate afterwards).
        for hh in range(num_heads):
            sl = slice(hh * head_size, (hh + 1) * head_size)
            s = lax.dot_general(q[:, sl], k[:, sl], trans_b,
                                preferred_element_type=jnp.float32)   # (S, S)
            s = s - jnp.max(s, axis=-1, keepdims=True)                # fp32 softmax
            p = jnp.exp(s)
            p = p * pl.reciprocal(jnp.sum(p, axis=-1, keepdims=True), approx=True)
            ctx_ref[:, sl] = jnp.dot(p.astype(cdt), v[:, sl],
                                     preferred_element_type=jnp.float32)
        ctx = ctx_ref[...].astype(cdt)

        # ---- DFFSelfOutput.dense + residual (DFFLayer) ----
        attn = jnp.dot(ctx, wo_ref[...], preferred_element_type=jnp.float32)
        attn = attn + bo_ref[...].astype(jnp.float32)
        h1 = attn + x_f32

        # ---- layernorm_after -> intermediate (GELU) -> output dense + residual ----
        hn = layer_norm(h1, g2_ref, b2_ref).astype(cdt)
        inter = jnp.dot(hn, wi_ref[...], preferred_element_type=jnp.float32)
        inter = inter + bi_ref[...].astype(jnp.float32)
        inter = jax.nn.gelu(inter, approximate=True).astype(cdt)      # tanh-GELU (EUP)
        out = jnp.dot(inter, wout_ref[...], preferred_element_type=jnp.float32)
        out = out + bout_ref[...].astype(jnp.float32) + h1

        out_ref[...] = out.astype(out_ref.dtype)

    return kernel


# ----------------------------------------------------------------------------
# Wrapper: whole encoder in a single pallas_call
# ----------------------------------------------------------------------------
def dff_encoder(x, layer_params, *, num_heads: int, eps: float):
    """DFFEncoder forward (default flags: no head_mask, no output_attentions)."""
    B, S, H = x.shape
    D = H // num_heads
    L = len(layer_params)
    I = layer_params[0]["wi"].shape[1]

    vec = lambda a: a.reshape(1, -1)   # biases / LN params as lane-major (1, N)

    # Stack per-layer weights on a leading L axis (pure JAX, traced once).
    stackw = lambda name: jnp.stack([p[name] for p in layer_params])         # (L, Hin, Hout)
    stackv = lambda name: jnp.stack([vec(p[name]) for p in layer_params])    # (L, 1, N)
    wqkv = jnp.stack([jnp.concatenate([p["wq"], p["wk"], p["wv"]], axis=1)
                      for p in layer_params])                                # (L, H, 3H)
    bqkv = jnp.stack([vec(jnp.concatenate([p["bq"], p["bk"], p["bv"]]))
                      for p in layer_params])                                # (L, 1, 3H)

    def lspec(shape):
        # Per-layer parameter block: indexed by the layer grid axis only.
        return pl.BlockSpec((pl.Squeezed(),) + shape,
                            lambda b, l, _s=len(shape): (l,) + (0,) * _s)

    x_spec = pl.BlockSpec((pl.Squeezed(), S, H), lambda b, l: (b, 0, 0))

    kernel = make_dff_encoder_kernel(num_heads, D, H, eps)

    return pl.pallas_call(
        kernel,
        out_shape=jax.ShapeDtypeStruct((B, S, H), x.dtype),
        grid_spec=pltpu.PrefetchScalarGridSpec(
            num_scalar_prefetch=0,
            grid=(B, L),                          # batch outer, layer inner (carry)
            in_specs=[x_spec,
                      lspec((1, H)), lspec((1, H)),         # LN-before gamma/beta
                      lspec((H, 3 * H)), lspec((1, 3 * H)), # fused QKV
                      lspec((H, H)), lspec((1, H)),         # attn output dense
                      lspec((1, H)), lspec((1, H)),         # LN-after gamma/beta
                      lspec((H, I)), lspec((1, I)),         # intermediate dense
                      lspec((I, H)), lspec((1, H))],        # output dense
            out_specs=x_spec,                               # resident across layer axis
            scratch_shapes=[pltpu.VMEM((S, H), jnp.float32)],  # per-head ctx slab
        ),
        compiler_params=pltpu.CompilerParams(
            dimension_semantics=("parallel", "arbitrary")),
    )(x,
      stackv("g1"), stackv("b1"),
      wqkv, bqkv,
      stackw("wo"), stackv("bo"),
      stackv("g2"), stackv("b2"),
      stackw("wi"), stackv("bi"),
      stackw("wout"), stackv("bout"))


# ----------------------------------------------------------------------------
# Pure-JAX reference mirroring the PyTorch forward
# ----------------------------------------------------------------------------
def _layer_norm_ref(t, g, b, eps):
    mu = jnp.mean(t, -1, keepdims=True)
    var = jnp.mean((t - mu) ** 2, -1, keepdims=True)
    return (t - mu) / jnp.sqrt(var + eps) * g + b


def dff_layer_ref(x, p, num_heads, eps):
    B, S, H = x.shape
    D = H // num_heads
    xn = _layer_norm_ref(x, p["g1"], p["b1"], eps)
    q = xn @ p["wq"] + p["bq"]
    k = xn @ p["wk"] + p["bk"]
    v = xn @ p["wv"] + p["bv"]
    split = lambda t: t.reshape(B, S, num_heads, D).transpose(0, 2, 1, 3)
    qh, kh, vh = split(q), split(k), split(v)
    scores = jnp.einsum("bhqd,bhkd->bhqk", qh, kh) / math.sqrt(D)
    probs = jax.nn.softmax(scores, axis=-1)
    ctx = jnp.einsum("bhqk,bhkd->bhqd", probs, vh)
    ctx = ctx.transpose(0, 2, 1, 3).reshape(B, S, H)
    h = ctx @ p["wo"] + p["bo"] + x
    hn = _layer_norm_ref(h, p["g2"], p["b2"], eps)
    inter = jax.nn.gelu(hn @ p["wi"] + p["bi"], approximate=True)
    return inter @ p["wout"] + p["bout"] + h


def dff_encoder_ref(x, layer_params, num_heads, eps):
    for p in layer_params:
        x = dff_layer_ref(x, p, num_heads, eps)
    return x


# ----------------------------------------------------------------------------
if __name__ == "__main__":
    # Small config consistent with the module:
    # hidden=32, heads=2, intermediate=128, layers=2, seq=8, batch=2
    B, S, H = 2, 8, 32
    NUM_HEADS = 2
    INTERMEDIATE = 128
    NUM_LAYERS = 2
    EPS = 1e-12

    key = jax.random.PRNGKey(0)
    key, xk = jax.random.split(key)
    x = jax.random.normal(xk, (B, S, H), dtype=jnp.float32)

    sc = 0.05
    layers = []
    for _ in range(NUM_LAYERS):
        key, *ks = jax.random.split(key, 17)
        layers.append(dict(
            g1=1.0 + 0.1 * jax.random.normal(ks[0], (H,), jnp.float32),
            b1=sc * jax.random.normal(ks[1], (H,), jnp.float32),
            wq=sc * jax.random.normal(ks[2], (H, H), jnp.float32),
            bq=sc * jax.random.normal(ks[3], (H,), jnp.float32),
            wk=sc * jax.random.normal(ks[4], (H, H), jnp.float32),
            bk=sc * jax.random.normal(ks[5], (H,), jnp.float32),
            wv=sc * jax.random.normal(ks[6], (H, H), jnp.float32),
            bv=sc * jax.random.normal(ks[7], (H,), jnp.float32),
            wo=sc * jax.random.normal(ks[8], (H, H), jnp.float32),
            bo=sc * jax.random.normal(ks[9], (H,), jnp.float32),
            g2=1.0 + 0.1 * jax.random.normal(ks[10], (H,), jnp.float32),
            b2=sc * jax.random.normal(ks[11], (H,), jnp.float32),
            wi=sc * jax.random.normal(ks[12], (H, INTERMEDIATE), jnp.float32),
            bi=sc * jax.random.normal(ks[13], (INTERMEDIATE,), jnp.float32),
            wout=sc * jax.random.normal(ks[14], (INTERMEDIATE, H), jnp.float32),
            bout=sc * jax.random.normal(ks[15], (H,), jnp.float32),
        ))

    out = dff_encoder(x, layers, num_heads=NUM_HEADS, eps=EPS)
    out = jax.block_until_ready(out)

    ref = dff_encoder_ref(x, layers, NUM_HEADS, EPS)
    max_err = float(jnp.max(jnp.abs(out - ref)))
    assert out.shape == (B, S, H)
    # approx=True reciprocal in the softmax loosens tolerance slightly
    assert jnp.allclose(out, ref, atol=5e-3, rtol=5e-3), max_err

    print("KERNEL_OK")
</pallas_src>

<mosaic_0001>
module attributes {stable_mosaic.version = 11 : i64} {
  func.func @kernel(%arg0: i32, %arg1: i32, %arg2: memref<1x8x32xf32, #tpu.memory_space<vmem>>, %arg3: memref<1x1x32xf32, #tpu.memory_space<vmem>>, %arg4: memref<1x1x32xf32, #tpu.memory_space<vmem>>, %arg5: memref<1x32x96xf32, #tpu.memory_space<vmem>>, %arg6: memref<1x1x96xf32, #tpu.memory_space<vmem>>, %arg7: memref<1x32x32xf32, #tpu.memory_space<vmem>>, %arg8: memref<1x1x32xf32, #tpu.memory_space<vmem>>, %arg9: memref<1x1x32xf32, #tpu.memory_space<vmem>>, %arg10: memref<1x1x32xf32, #tpu.memory_space<vmem>>, %arg11: memref<1x32x128xf32, #tpu.memory_space<vmem>>, %arg12: memref<1x1x128xf32, #tpu.memory_space<vmem>>, %arg13: memref<1x128x32xf32, #tpu.memory_space<vmem>>, %arg14: memref<1x1x32xf32, #tpu.memory_space<vmem>>, %arg15: memref<1x8x32xf32, #tpu.memory_space<vmem>>, %arg16: memref<8x32xf32, #tpu.memory_space<vmem>>) attributes {dimension_semantics = [#tpu.dimension_semantics<parallel>, #tpu.dimension_semantics<arbitrary>], iteration_bounds = array<i64: 2, 2>, scalar_prefetch = 0 : i64, scratch_operands = 1 : i64, tpu.core_type = #tpu.core_type<tc>, window_params = [{transform_indices = @transform_0, window_bounds = array<i64: 1, 8, 32>}, {transform_indices = @transform_1, window_bounds = array<i64: 1, 1, 32>}, {transform_indices = @transform_2, window_bounds = array<i64: 1, 1, 32>}, {transform_indices = @transform_3, window_bounds = array<i64: 1, 32, 96>}, {transform_indices = @transform_4, window_bounds = array<i64: 1, 1, 96>}, {transform_indices = @transform_5, window_bounds = array<i64: 1, 32, 32>}, {transform_indices = @transform_6, window_bounds = array<i64: 1, 1, 32>}, {transform_indices = @transform_7, window_bounds = array<i64: 1, 1, 32>}, {transform_indices = @transform_8, window_bounds = array<i64: 1, 1, 32>}, {transform_indices = @transform_9, window_bounds = array<i64: 1, 32, 128>}, {transform_indices = @transform_10, window_bounds = array<i64: 1, 1, 128>}, {transform_indices = @transform_11, window_bounds = array<i64: 1, 128, 32>}, {transform_indices = @transform_12, window_bounds = array<i64: 1, 1, 32>}, {transform_indices = @transform_13, window_bounds = array<i64: 1, 8, 32>}]} {
    %c0_i32 = arith.constant 0 : i32
    %0 = arith.cmpi eq, %arg1, %c0_i32 : i32
    %1 = arith.extui %0 : i1 to i32
    %c0_i32_0 = arith.constant 0 : i32
    %2 = arith.cmpi ne, %1, %c0_i32_0 : i32
    scf.if %2 {
      %c0_73 = arith.constant 0 : index
      %c0_74 = arith.constant 0 : index
      %c0_75 = arith.constant 0 : index
      %137 = vector.load %arg2[%c0_73, %c0_74, %c0_75] : memref<1x8x32xf32, #tpu.memory_space<vmem>>, vector<1x8x32xf32>
      %138 = vector.shape_cast %137 : vector<1x8x32xf32> to vector<8x32xf32>
      %c0_76 = arith.constant 0 : index
      %c0_77 = arith.constant 0 : index
      %c0_78 = arith.constant 0 : index
      %139 = vector.load %arg15[%c0_76, %c0_77, %c0_78] : memref<1x8x32xf32, #tpu.memory_space<vmem>>, vector<1x8x32xf32>
      %140 = vector.shape_cast %139 : vector<1x8x32xf32> to vector<8x32xf32>
      %141 = vector.shape_cast %138 : vector<8x32xf32> to vector<1x8x32xf32>
      tpu.vector_store %arg15[%c0_76, %c0_77, %c0_78], %141 {strides = array<i32>} : memref<1x8x32xf32, #tpu.memory_space<vmem>>, vector<1x8x32xf32>,
    } else {
    }
    %c0 = arith.constant 0 : index
    %c0_1 = arith.constant 0 : index
    %c0_2 = arith.constant 0 : index
    %3 = vector.load %arg15[%c0, %c0_1, %c0_2] : memref<1x8x32xf32, #tpu.memory_space<vmem>>, vector<1x8x32xf32>
    %4 = vector.shape_cast %3 : vector<1x8x32xf32> to vector<8x32xf32>
    %cst = arith.constant dense<0.000000e+00> : vector<8xf32>
    %5 = vector.multi_reduction <add>, %4, %cst [1] : vector<8x32xf32> to vector<8xf32>
    %6 = vector.shape_cast %5 : vector<8xf32> to vector<8x1xf32>
    %cst_3 = arith.constant 3.200000e+01 : f32
    %7 = vector.broadcast %cst_3 : f32 to vector<8x1xf32>
    %8 = arith.divf %6, %7 : vector<8x1xf32>
    %9 = vector.broadcast %8 : vector<8x1xf32> to vector<8x32xf32>
    %10 = arith.subf %4, %9 : vector<8x32xf32>
    %11 = arith.mulf %10, %10 : vector<8x32xf32>
    %cst_4 = arith.constant dense<0.000000e+00> : vector<8xf32>
    %12 = vector.multi_reduction <add>, %11, %cst_4 [1] : vector<8x32xf32> to vector<8xf32>
    %13 = vector.shape_cast %12 : vector<8xf32> to vector<8x1xf32>
    %cst_5 = arith.constant 3.200000e+01 : f32
    %14 = vector.broadcast %cst_5 : f32 to vector<8x1xf32>
    %15 = arith.divf %13, %14 : vector<8x1xf32>
    %cst_6 = arith.constant 9.99999996E-13 : f32
    %16 = vector.broadcast %cst_6 : f32 to vector<8x1xf32>
    %17 = arith.addf %15, %16 : vector<8x1xf32>
    %18 = math.rsqrt %17 : vector<8x1xf32>
    %19 = vector.broadcast %18 : vector<8x1xf32> to vector<8x32xf32>
    %20 = arith.mulf %10, %19 : vector<8x32xf32>
    %c0_7 = arith.constant 0 : index
    %c0_8 = arith.constant 0 : index
    %c0_9 = arith.constant 0 : index
    %21 = vector.load %arg3[%c0_7, %c0_8, %c0_9] : memref<1x1x32xf32, #tpu.memory_space<vmem>>, vector<1x1x32xf32>
    %22 = vector.shape_cast %21 : vector<1x1x32xf32> to vector<1x32xf32>
    %23 = vector.broadcast %22 : vector<1x32xf32> to vector<8x32xf32>
    %24 = arith.mulf %20, %23 : vector<8x32xf32>
    %c0_10 = arith.constant 0 : index
    %c0_11 = arith.constant 0 : index
    %c0_12 = arith.constant 0 : index
    %25 = vector.load %arg4[%c0_10, %c0_11, %c0_12] : memref<1x1x32xf32, #tpu.memory_space<vmem>>, vector<1x1x32xf32>
    %26 = vector.shape_cast %25 : vector<1x1x32xf32> to vector<1x32xf32>
    %27 = vector.broadcast %26 : vector<1x32xf32> to vector<8x32xf32>
    %28 = arith.addf %24, %27 : vector<8x32xf32>
    %c0_13 = arith.constant 0 : index
    %c0_14 = arith.constant 0 : index
    %c0_15 = arith.constant 0 : index
    %29 = vector.load %arg5[%c0_13, %c0_14, %c0_15] : memref<1x32x96xf32, #tpu.memory_space<vmem>>, vector<1x32x96xf32>
    %30 = vector.shape_cast %29 : vector<1x32x96xf32> to vector<32x96xf32>
    %cst_16 = arith.constant dense<0.000000e+00> : vector<8x96xf32>
    %31 = tpu.matmul %28, %30, %cst_16 {dimension_numbers = #tpu.dot_dimension_numbers<[1], [0], [0], [1], [0, 0, 1, 1], [], []>} : vector<8x32xf32>, vector<32x96xf32>, vector<8x96xf32> -> vector<8x96xf32>
    %c0_17 = arith.constant 0 : index
    %c0_18 = arith.constant 0 : index
    %c0_19 = arith.constant 0 : index
    %32 = vector.load %arg6[%c0_17, %c0_18, %c0_19] : memref<1x1x96xf32, #tpu.memory_space<vmem>>, vector<1x1x96xf32>
    %33 = vector.shape_cast %32 : vector<1x1x96xf32> to vector<1x96xf32>
    %34 = vector.broadcast %33 : vector<1x96xf32> to vector<8x96xf32>
    %35 = arith.addf %31, %34 : vector<8x96xf32>
    %36 = vector.extract_strided_slice %35 {offsets = [0, 0], sizes = [8, 32], strides = [1, 1]} : vector<8x96xf32> to vector<8x32xf32>
    %cst_20 = arith.constant 2.500000e-01 : f32
    %37 = vector.broadcast %cst_20 : f32 to vector<8x32xf32>
    %38 = arith.mulf %36, %37 : vector<8x32xf32>
    %39 = vector.extract_strided_slice %35 {offsets = [0, 32], sizes = [8, 32], strides = [1, 1]} : vector<8x96xf32> to vector<8x32xf32>
    %40 = vector.extract_strided_slice %35 {offsets = [0, 64], sizes = [8, 32], strides = [1, 1]} : vector<8x96xf32> to vector<8x32xf32>
    %41 = vector.extract_strided_slice %38 {offsets = [0, 0], sizes = [8, 16], strides = [1, 1]} : vector<8x32xf32> to vector<8x16xf32>
    %42 = vector.extract_strided_slice %39 {offsets = [0, 0], sizes = [8, 16], strides = [1, 1]} : vector<8x32xf32> to vector<8x16xf32>
    %cst_21 = arith.constant dense<0.000000e+00> : vector<8x8xf32>
    %43 = tpu.matmul %41, %42, %cst_21 {dimension_numbers = #tpu.dot_dimension_numbers<[1], [1], [0], [0], [0, 0, 1, 0], [], []>} : vector<8x16xf32>, vector<8x16xf32>, vector<8x8xf32> -> vector<8x8xf32>
    %cst_22 = arith.constant dense<0xFF800000> : vector<8xf32>
    %44 = vector.multi_reduction <maximumf>, %43, %cst_22 [1] : vector<8x8xf32> to vector<8xf32>
    %45 = vector.shape_cast %44 : vector<8xf32> to vector<8x1xf32>
    %46 = vector.broadcast %45 : vector<8x1xf32> to vector<8x8xf32>
    %47 = arith.subf %43, %46 : vector<8x8xf32>
    %48 = math.exp %47 : vector<8x8xf32>
    %cst_23 = arith.constant dense<0.000000e+00> : vector<8xf32>
    %49 = vector.multi_reduction <add>, %48, %cst_23 [1] : vector<8x8xf32> to vector<8xf32>
    %50 = vector.shape_cast %49 : vector<8xf32> to vector<8x1xf32>
    %51 = tpu.reciprocal %50 {approx = true} : vector<8x1xf32> -> vector<8x1xf32>
    %52 = vector.broadcast %51 : vector<8x1xf32> to vector<8x8xf32>
    %53 = arith.mulf %48, %52 : vector<8x8xf32>
    %54 = vector.extract_strided_slice %40 {offsets = [0, 0], sizes = [8, 16], strides = [1, 1]} : vector<8x32xf32> to vector<8x16xf32>
    %cst_24 = arith.constant dense<0.000000e+00> : vector<8x16xf32>
    %55 = tpu.matmul %53, %54, %cst_24 {dimension_numbers = #tpu.dot_dimension_numbers<[1], [0], [0], [1], [0, 0, 1, 1], [], []>} : vector<8x8xf32>, vector<8x16xf32>, vector<8x16xf32> -> vector<8x16xf32>
    %c0_25 = arith.constant 0 : index
    %c0_26 = arith.constant 0 : index
    %56 = vector.load %arg16[%c0_25, %c0_26] : memref<8x32xf32, #tpu.memory_space<vmem>>, vector<8x16xf32>
    tpu.vector_store %arg16[%c0_25, %c0_26], %55 {strides = array<i32>} : memref<8x32xf32, #tpu.memory_space<vmem>>, vector<8x16xf32>,
    %57 = vector.extract_strided_slice %38 {offsets = [0, 16], sizes = [8, 16], strides = [1, 1]} : vector<8x32xf32> to vector<8x16xf32>
    %58 = vector.extract_strided_slice %39 {offsets = [0, 16], sizes = [8, 16], strides = [1, 1]} : vector<8x32xf32> to vector<8x16xf32>
    %cst_27 = arith.constant dense<0.000000e+00> : vector<8x8xf32>
    %59 = tpu.matmul %57, %58, %cst_27 {dimension_numbers = #tpu.dot_dimension_numbers<[1], [1], [0], [0], [0, 0, 1, 0], [], []>} : vector<8x16xf32>, vector<8x16xf32>, vector<8x8xf32> -> vector<8x8xf32>
    %cst_28 = arith.constant dense<0xFF800000> : vector<8xf32>
    %60 = vector.multi_reduction <maximumf>, %59, %cst_28 [1] : vector<8x8xf32> to vector<8xf32>
    %61 = vector.shape_cast %60 : vector<8xf32> to vector<8x1xf32>
    %62 = vector.broadcast %61 : vector<8x1xf32> to vector<8x8xf32>
    %63 = arith.subf %59, %62 : vector<8x8xf32>
    %64 = math.exp %63 : vector<8x8xf32>
    %cst_29 = arith.constant dense<0.000000e+00> : vector<8xf32>
    %65 = vector.multi_reduction <add>, %64, %cst_29 [1] : vector<8x8xf32> to vector<8xf32>
    %66 = vector.shape_cast %65 : vector<8xf32> to vector<8x1xf32>
    %67 = tpu.reciprocal %66 {approx = true} : vector<8x1xf32> -> vector<8x1xf32>
    %68 = vector.broadcast %67 : vector<8x1xf32> to vector<8x8xf32>
    %69 = arith.mulf %64, %68 : vector<8x8xf32>
    %70 = vector.extract_strided_slice %40 {offsets = [0, 16], sizes = [8, 16], strides = [1, 1]} : vector<8x32xf32> to vector<8x16xf32>
    %cst_30 = arith.constant dense<0.000000e+00> : vector<8x16xf32>
    %71 = tpu.matmul %69, %70, %cst_30 {dimension_numbers = #tpu.dot_dimension_numbers<[1], [0], [0], [1], [0, 0, 1, 1], [], []>} : vector<8x8xf32>, vector<8x16xf32>, vector<8x16xf32> -> vector<8x16xf32>
    %c0_31 = arith.constant 0 : index
    %c16 = arith.constant 16 : index
    %72 = vector.load %arg16[%c0_31, %c16] : memref<8x32xf32, #tpu.memory_space<vmem>>, vector<8x16xf32>
    tpu.vector_store %arg16[%c0_31, %c16], %71 {strides = array<i32>} : memref<8x32xf32, #tpu.memory_space<vmem>>, vector<8x16xf32>,
    %c0_32 = arith.constant 0 : index
    %c0_33 = arith.constant 0 : index
    %73 = vector.load %arg16[%c0_32, %c0_33] : memref<8x32xf32, #tpu.memory_space<vmem>>, vector<8x32xf32>
    %c0_34 = arith.constant 0 : index
    %c0_35 = arith.constant 0 : index
    %c0_36 = arith.constant 0 : index
    %74 = vector.load %arg7[%c0_34, %c0_35, %c0_36] : memref<1x32x32xf32, #tpu.memory_space<vmem>>, vector<1x32x32xf32>
    %75 = vector.shape_cast %74 : vector<1x32x32xf32> to vector<32x32xf32>
    %cst_37 = arith.constant dense<0.000000e+00> : vector<8x32xf32>
    %76 = tpu.matmul %73, %75, %cst_37 {dimension_numbers = #tpu.dot_dimension_numbers<[1], [0], [0], [1], [0, 0, 1, 1], [], []>} : vector<8x32xf32>, vector<32x32xf32>, vector<8x32xf32> -> vector<8x32xf32>
    %c0_38 = arith.constant 0 : index
    %c0_39 = arith.constant 0 : index
    %c0_40 = arith.constant 0 : index
    %77 = vector.load %arg8[%c0_38, %c0_39, %c0_40] : memref<1x1x32xf32, #tpu.memory_space<vmem>>, vector<1x1x32xf32>
    %78 = vector.shape_cast %77 : vector<1x1x32xf32> to vector<1x32xf32>
    %79 = vector.broadcast %78 : vector<1x32xf32> to vector<8x32xf32>
    %80 = arith.addf %76, %79 : vector<8x32xf32>
    %81 = arith.addf %80, %4 : vector<8x32xf32>
    %cst_41 = arith.constant dense<0.000000e+00> : vector<8xf32>
    %82 = vector.multi_reduction <add>, %81, %cst_41 [1] : vector<8x32xf32> to vector<8xf32>
    %83 = vector.shape_cast %82 : vector<8xf32> to vector<8x1xf32>
    %cst_42 = arith.constant 3.200000e+01 : f32
    %84 = vector.broadcast %cst_42 : f32 to vector<8x1xf32>
    %85 = arith.divf %83, %84 : vector<8x1xf32>
    %86 = vector.broadcast %85 : vector<8x1xf32> to vector<8x32xf32>
    %87 = arith.subf %81, %86 : vector<8x32xf32>
    %88 = arith.mulf %87, %87 : vector<8x32xf32>
    %cst_43 = arith.constant dense<0.000000e+00> : vector<8xf32>
    %89 = vector.multi_reduction <add>, %88, %cst_43 [1] : vector<8x32xf32> to vector<8xf32>
    %90 = vector.shape_cast %89 : vector<8xf32> to vector<8x1xf32>
    %cst_44 = arith.constant 3.200000e+01 : f32
    %91 = vector.broadcast %cst_44 : f32 to vector<8x1xf32>
    %92 = arith.divf %90, %91 : vector<8x1xf32>
    %cst_45 = arith.constant 9.99999996E-13 : f32
    %93 = vector.broadcast %cst_45 : f32 to vector<8x1xf32>
    %94 = arith.addf %92, %93 : vector<8x1xf32>
    %95 = math.rsqrt %94 : vector<8x1xf32>
    %96 = vector.broadcast %95 : vector<8x1xf32> to vector<8x32xf32>
    %97 = arith.mulf %87, %96 : vector<8x32xf32>
    %c0_46 = arith.constant 0 : index
    %c0_47 = arith.constant 0 : index
    %c0_48 = arith.constant 0 : index
    %98 = vector.load %arg9[%c0_46, %c0_47, %c0_48] : memref<1x1x32xf32, #tpu.memory_space<vmem>>, vector<1x1x32xf32>
    %99 = vector.shape_cast %98 : vector<1x1x32xf32> to vector<1x32xf32>
    %100 = vector.broadcast %99 : vector<1x32xf32> to vector<8x32xf32>
    %101 = arith.mulf %97, %100 : vector<8x32xf32>
    %c0_49 = arith.constant 0 : index
    %c0_50 = arith.constant 0 : index
    %c0_51 = arith.constant 0 : index
    %102 = vector.load %arg10[%c0_49, %c0_50, %c0_51] : memref<1x1x32xf32, #tpu.memory_space<vmem>>, vector<1x1x32xf32>
    %103 = vector.shape_cast %102 : vector<1x1x32xf32> to vector<1x32xf32>
    %104 = vector.broadcast %103 : vector<1x32xf32> to vector<8x32xf32>
    %105 = arith.addf %101, %104 : vector<8x32xf32>
    %c0_52 = arith.constant 0 : index
    %c0_53 = arith.constant 0 : index
    %c0_54 = arith.constant 0 : index
    %106 = vector.load %arg11[%c0_52, %c0_53, %c0_54] : memref<1x32x128xf32, #tpu.memory_space<vmem>>, vector<1x32x128xf32>
    %107 = vector.shape_cast %106 : vector<1x32x128xf32> to vector<32x128xf32>
    %cst_55 = arith.constant dense<0.000000e+00> : vector<8x128xf32>
    %108 = tpu.matmul %105, %107, %cst_55 {dimension_numbers = #tpu.dot_dimension_numbers<[1], [0], [0], [1], [0, 0, 1, 1], [], []>} : vector<8x32xf32>, vector<32x128xf32>, vector<8x128xf32> -> vector<8x128xf32>
    %c0_56 = arith.constant 0 : index
    %c0_57 = arith.constant 0 : index
    %c0_58 = arith.constant 0 : index
    %109 = vector.load %arg12[%c0_56, %c0_57, %c0_58] : memref<1x1x128xf32, #tpu.memory_space<vmem>>, vector<1x1x128xf32>
    %110 = vector.shape_cast %109 : vector<1x1x128xf32> to vector<1x128xf32>
    %111 = vector.broadcast %110 : vector<1x128xf32> to vector<8x128xf32>
    %112 = arith.addf %108, %111 : vector<8x128xf32>
    %113 = arith.mulf %112, %112 : vector<8x128xf32>
    %114 = arith.mulf %112, %113 : vector<8x128xf32>
    %cst_59 = arith.constant 4.471500e-02 : f32
    %115 = vector.broadcast %cst_59 : f32 to vector<8x128xf32>
    %116 = arith.mulf %115, %114 : vector<8x128xf32>
    %117 = arith.addf %112, %116 : vector<8x128xf32>
    %cst_60 = arith.constant 0.797884583 : f32
    %118 = vector.broadcast %cst_60 : f32 to vector<8x128xf32>
    %119 = arith.mulf %118, %117 : vector<8x128xf32>
    %120 = math.tanh %119 : vector<8x128xf32>
    %cst_61 = arith.constant 1.000000e+00 : f32
    %121 = vector.broadcast %cst_61 : f32 to vector<8x128xf32>
    %122 = arith.addf %121, %120 : vector<8x128xf32>
    %cst_62 = arith.constant 5.000000e-01 : f32
    %123 = vector.broadcast %cst_62 : f32 to vector<8x128xf32>
    %124 = arith.mulf %123, %122 : vector<8x128xf32>
    %125 = arith.mulf %112, %124 : vector<8x128xf32>
    %c0_63 = arith.constant 0 : index
    %c0_64 = arith.constant 0 : index
    %c0_65 = arith.constant 0 : index
    %126 = vector.load %arg13[%c0_63, %c0_64, %c0_65] : memref<1x128x32xf32, #tpu.memory_space<vmem>>, vector<1x128x32xf32>
    %127 = vector.shape_cast %126 : vector<1x128x32xf32> to vector<128x32xf32>
    %cst_66 = arith.constant dense<0.000000e+00> : vector<8x32xf32>
    %128 = tpu.matmul %125, %127, %cst_66 {dimension_numbers = #tpu.dot_dimension_numbers<[1], [0], [0], [1], [0, 0, 1, 1], [], []>} : vector<8x128xf32>, vector<128x32xf32>, vector<8x32xf32> -> vector<8x32xf32>
    %c0_67 = arith.constant 0 : index
    %c0_68 = arith.constant 0 : index
    %c0_69 = arith.constant 0 : index
    %129 = vector.load %arg14[%c0_67, %c0_68, %c0_69] : memref<1x1x32xf32, #tpu.memory_space<vmem>>, vector<1x1x32xf32>
    %130 = vector.shape_cast %129 : vector<1x1x32xf32> to vector<1x32xf32>
    %131 = vector.broadcast %130 : vector<1x32xf32> to vector<8x32xf32>
    %132 = arith.addf %128, %131 : vector<8x32xf32>
    %133 = arith.addf %132, %81 : vector<8x32xf32>
    %c0_70 = arith.constant 0 : index
    %c0_71 = arith.constant 0 : index
    %c0_72 = arith.constant 0 : index
    %134 = vector.load %arg15[%c0_70, %c0_71, %c0_72] : memref<1x8x32xf32, #tpu.memory_space<vmem>>, vector<1x8x32xf32>
    %135 = vector.shape_cast %134 : vector<1x8x32xf32> to vector<8x32xf32>
    %136 = vector.shape_cast %133 : vector<8x32xf32> to vector<1x8x32xf32>
    tpu.vector_store %arg15[%c0_70, %c0_71, %c0_72], %136 {strides = array<i32>} : memref<1x8x32xf32, #tpu.memory_space<vmem>>, vector<1x8x32xf32>,
    return
  }
  func.func @transform_0(%arg0: i32, %arg1: i32) -> (i32, i32, i32) {
    %c0_i32 = arith.constant 0 : i32
    %c0_i32_0 = arith.constant 0 : i32
    %c0_i32_1 = arith.constant 0 : i32
    return %arg0, %c0_i32, %c0_i32_0 : i32, i32, i32
  }
  func.func @transform_1(%arg0: i32, %arg1: i32) -> (i32, i32, i32) {
    %c0_i32 = arith.constant 0 : i32
    %c0_i32_0 = arith.constant 0 : i32
    %c0_i32_1 = arith.constant 0 : i32
    return %arg1, %c0_i32, %c0_i32_0 : i32, i32, i32
  }
  func.func @transform_2(%arg0: i32, %arg1: i32) -> (i32, i32, i32) {
    %c0_i32 = arith.constant 0 : i32
    %c0_i32_0 = arith.constant 0 : i32
    %c0_i32_1 = arith.constant 0 : i32
    return %arg1, %c0_i32, %c0_i32_0 : i32, i32, i32
  }
  func.func @transform_3(%arg0: i32, %arg1: i32) -> (i32, i32, i32) {
    %c0_i32 = arith.constant 0 : i32
    %c0_i32_0 = arith.constant 0 : i32
    %c0_i32_1 = arith.constant 0 : i32
    return %arg1, %c0_i32, %c0_i32_0 : i32, i32, i32
  }
  func.func @transform_4(%arg0: i32, %arg1: i32) -> (i32, i32, i32) {
    %c0_i32 = arith.constant 0 : i32
    %c0_i32_0 = arith.constant 0 : i32
    %c0_i32_1 = arith.constant 0 : i32
    return %arg1, %c0_i32, %c0_i32_0 : i32, i32, i32
  }
  func.func @transform_5(%arg0: i32, %arg1: i32) -> (i32, i32, i32) {
    %c0_i32 = arith.constant 0 : i32
    %c0_i32_0 = arith.constant 0 : i32
    %c0_i32_1 = arith.constant 0 : i32
    return %arg1, %c0_i32, %c0_i32_0 : i32, i32, i32
  }
  func.func @transform_6(%arg0: i32, %arg1: i32) -> (i32, i32, i32) {
    %c0_i32 = arith.constant 0 : i32
    %c0_i32_0 = arith.constant 0 : i32
    %c0_i32_1 = arith.constant 0 : i32
    return %arg1, %c0_i32, %c0_i32_0 : i32, i32, i32
  }
  func.func @transform_7(%arg0: i32, %arg1: i32) -> (i32, i32, i32) {
    %c0_i32 = arith.constant 0 : i32
    %c0_i32_0 = arith.constant 0 : i32
    %c0_i32_1 = arith.constant 0 : i32
    return %arg1, %c0_i32, %c0_i32_0 : i32, i32, i32
  }
  func.func @transform_8(%arg0: i32, %arg1: i32) -> (i32, i32, i32) {
    %c0_i32 = arith.constant 0 : i32
    %c0_i32_0 = arith.constant 0 : i32
    %c0_i32_1 = arith.constant 0 : i32
    return %arg1, %c0_i32, %c0_i32_0 : i32, i32, i32
  }
  func.func @transform_9(%arg0: i32, %arg1: i32) -> (i32, i32, i32) {
    %c0_i32 = arith.constant 0 : i32
    %c0_i32_0 = arith.constant 0 : i32
    %c0_i32_1 = arith.constant 0 : i32
    return %arg1, %c0_i32, %c0_i32_0 : i32, i32, i32
  }
  func.func @transform_10(%arg0: i32, %arg1: i32) -> (i32, i32, i32) {
    %c0_i32 = arith.constant 0 : i32
    %c0_i32_0 = arith.constant 0 : i32
    %c0_i32_1 = arith.constant 0 : i32
    return %arg1, %c0_i32, %c0_i32_0 : i32, i32, i32
  }
  func.func @transform_11(%arg0: i32, %arg1: i32) -> (i32, i32, i32) {
    %c0_i32 = arith.constant 0 : i32
    %c0_i32_0 = arith.constant 0 : i32
    %c0_i32_1 = arith.constant 0 : i32
    return %arg1, %c0_i32, %c0_i32_0 : i32, i32, i32
  }
  func.func @transform_12(%arg0: i32, %arg1: i32) -> (i32, i32, i32) {
    %c0_i32 = arith.constant 0 : i32
    %c0_i32_0 = arith.constant 0 : i32
    %c0_i32_1 = arith.constant 0 : i32
    return %arg1, %c0_i32, %c0_i32_0 : i32, i32, i32
  }
  func.func @transform_13(%arg0: i32, %arg1: i32) -> (i32, i32, i32) {
    %c0_i32 = arith.constant 0 : i32
    %c0_i32_0 = arith.constant 0 : i32
    %c0_i32_1 = arith.constant 0 : i32
    return %arg0, %c0_i32, %c0_i32_0 : i32, i32, i32
  }
}

</mosaic_0001>

<bundles_post_ra>
// kernel: tpu_custom_call.1
= control target key start
LH: loop header
LB: loop body
LE: loop exit
PB: predicated region body
PF: predicated region fallthrough
CT: control target
= control target key end

     0   :  { %s2423_s0 = inlined_call_operand.vmem [shape: f32[2,8,32], index: 0, kind: input, shape index: {}]   ;;  %s2424_s1 = inlined_call_operand.vmem [shape: f32[2,1,32], index: 1, kind: input, shape index: {}]   ;;  %s2425_s2 = inlined_call_operand.vmem [shape: f32[2,1,32], index: 2, kind: input, shape index: {}]   ;;  %s2426_s3 = inlined_call_operand.vmem [shape: f32[2,32,96], index: 3, kind: input, shape index: {}]   ;;  %s2427_s4 = inlined_call_operand.vmem [shape: f32[2,1,96], index: 4, kind: input, shape index: {}]   ;;  %s2428_s5 = inlined_call_operand.vmem [shape: f32[2,32,32], index: 5, kind: input, shape index: {}]   ;;  %s2429_s6 = inlined_call_operand.vmem [shape: f32[2,1,32], index: 6, kind: input, shape index: {}]   ;;  %s2430_s7 = inlined_call_operand.vmem [shape: f32[2,1,32], index: 7, kind: input, shape index: {}]   ;;  %s2431_s8 = inlined_call_operand.vmem [shape: f32[2,1,32], index: 8, kind: input, shape index: {}]   ;;  %s2432_s9 = inlined_call_operand.vmem [shape: f32[2,32,128], index: 9, kind: input, shape index: {}]   ;;  %s2433_s10 = inlined_call_operand.vmem [shape: f32[2,1,128], index: 10, kind: input, shape index: {}]   ;;  %s2434_s11 = inlined_call_operand.vmem [shape: f32[2,128,32], index: 11, kind: input, shape index: {}]   ;;  %s2435_s12 = inlined_call_operand.vmem [shape: f32[2,1,32], index: 12, kind: input, shape index: {}]   ;;  %s2436_s13 = inlined_call_operand.hbm [shape: f32[2,8,32], index: 13, kind: output, shape index: {}]  }
   0x1   :  { %2452 = sst [smem:[#allocation19_spill]] %s2423_s0 }
   0x2   :  { %2453 = sst [smem:[#allocation20_spill]] %s2426_s3 }
   0x3   :  { %2454 = sst [smem:[#allocation21_spill]] %s2428_s5 }
   0x4   :  { %2455 = sst [smem:[#allocation22_spill]] %s2430_s7 }
   0x5   :  { %2456 = sst [smem:[#allocation23_spill]] %s2434_s11 }
   0x6   :  { %2457 = sst [smem:[#allocation24_spill]] %s2436_s13 }
   0x7   :  { %18 = vsyncpa [#allocation4], 0 }
   0x8   :  { %20 = vsyncpa [#allocation4 + $0x1], 0  ;;  %s2091_s25 = smov 0   ;;  %s2093_s26 = smov 0  }
   0x9   :  { %s2095_s27 = smov 0   ;;  %s2097_s28 = smov 0  }
   0xa   :  { %s2099_s29 = smov 0   ;;  %s2101_s30 = smov 0  }
   0xb   :  { %s2103_s14 = smov 0   ;;  %s2105_s15 = smov 0  }
   0xc LB: > { %2458 = sst [smem:[#allocation6_spill]] %s1981_s25  ;;  %s1610_s16 = sadd.s32 4294967295, %s2009_s15   ;;  %s2009_s15 = sphi %s2105_s15, %s26_s15   ;;  %s2005_s14 = sphi %s2103_s14, %s2499_s14   ;;  %s2001_s30 = sphi %s2101_s30, %s2498_s30   ;;  %s1997_s29 = sphi %s2099_s29, %s2497_s29   ;;  %s1993_s28 = sphi %s2097_s28, %s2496_s28   ;;  %s1989_s27 = sphi %s2095_s27, %s2495_s27   ;;  %s1985_s26 = sphi %s2093_s26, %s2494_s26   ;;  %s1981_s25 = sphi %s2091_s25, %s2493_s25  }
   0xd   : > { %2459 = sst [smem:[#allocation7_spill]] %s1985_s26  ;;  %s1611_s17 = sadd.s32 4294967294, %s2009_s15  }
   0xe   : > { %2460 = sst [smem:[#allocation8_spill]] %s1989_s27  ;;  %s35_s18 = sadd.s32 1, %s2001_s30 }
   0xf   : > { %2461 = sst [smem:[#allocation9_spill]] %s1993_s28  ;;  %p36_p0 = scmp.ge.s32.totalorder %s35_s18, 2 }
  0x10   : > { %2462 = sst [smem:[#allocation10_spill]] %s1997_s29  ;;  %s38_s19 = sadd.s32 1, %s2005_s14 }
  0x11   : > { %2463 = sst [smem:[#allocation11_spill]] %s2001_s30  ;;  %p393_p1 = scmp.ne.s32.totalorder %s1989_s27, %s1985_s26 }
  0x12   : > { %2464 = sst [smem:[#allocation12_spill]] %s2005_s14  ;;  %p394_p2 = scmp.eq.s32.totalorder %s1610_s16, 3 }
  0x13   : > { %2465 = sst [smem:[#allocation13_spill]] %s2009_s15  ;;  %s2501_s18 = smov (%p36_p0, %s35_s18), 0 }
  0x14   : > { %2466 = sst [smem:[#allocation14_spill]] %s2501_s18  ;;  %s2503_s19 = smov (!%p36_p0, %s38_s19), %s2005_s14 }
  0x15   : > { %p2140_p3 = por %p394_p2, %p393_p1  ;;  %p399_p4 = scmp.ne.s32.totalorder %s1985_s26, %s1981_s25 }
  0x16   : > { %p40_p5 = scmp.ge.s32.totalorder %s2503_s19, 2  ;;  %p400_p6 = scmp.eq.s32.totalorder %s1611_s17, 3 }
  0x17   : > { %s2467_s20 = scalar_select %p2140_p3, 1, 0 }
  0x18   : > { %p1614_p7 = scmp.ge.s32.totalorder %s2009_s15, 1  ;;  %p505_p8 = scmp.lt.s32.totalorder %s2009_s15, 5 }
  0x19   : > { %2468 = sst [smem:[#allocation15_spill]] %s2467_s20  ;;  %s2505_s19 = smov (%p40_p5, %s2503_s19), 0 }
  0x1a   : > { %2469 = sst [smem:[#allocation16_spill]] %s2505_s19  ;;  %p2150_p9 = por %p400_p6, %p399_p4 }
  0x1b   : > { %p506_p10 = pnand %p1614_p7, %p505_p8  ;;  %s380_s22 = ssub.s32 %s2005_s14, %s2505_s19 }
  0x1c   : > { %s2470_s21 = scalar_select %p2150_p9, 1, 0 }
  0x1d   : > { %s383_s23 = sadd.s32 1, %s1989_s27  ;;  %p381_p11 = scmp.eq.s32.totalorder %s380_s22, 0 }
  0x1e   : > { %2471 = sst [smem:[#allocation17_spill]] %s2470_s21  ;;  %509 = sbr.rel (%p506_p10) target bundleno = 2565 (0xa05), region = 72 }
  0x1f   : > { %s2158_s24 = scalar_select %p381_p11, %s1989_s27, %s383_s23  }
  0x20   : > { %s2440_s16 = sand.u32 (!%p506_p10), 1, %s1985_s26   ;;  %p592_p12 = scmp.lt.s32.totalorder (!%p506_p10), %s1997_s29, 1 }
  0x21   : > { %2472 = sst [smem:[#allocation18_spill]] %s2158_s24  ;;  %s1615_s17 = sshll.u32 (!%p506_p10), %s2440_s16, 3 }
  0x22   : > { %p596_p13 = scmp.lt.s32.totalorder (!%p506_p10), %s1993_s28, 1  ;;  %s2473_s0 = sld [smem:[#allocation19_spill]] (!%p506_p10) }
  0x23   : > { %s2474_s3 = sld [smem:[#allocation20_spill]] (!%p506_p10)  ;;  %s2475_s5 = sld [smem:[#allocation21_spill]] (!%p506_p10) }
  0x24   : > { %s2477_s27 = sld [smem:[#allocation23_spill]] (!%p506_p10)  ;;  %s2226_s26 = scalar_lea.vmem (!%p506_p10), [#allocation3], %s1615_s17 }
  0x25   : > { %s593_s18 = scalar_select %p592_p12, %s1997_s29, 1 }
  0x26   : > { %s2167_s30 = scalar_select %p596_p13, %s1993_s28, 1 }
  0x27   : > { %s1616_s22 = sshll.u32 %s593_s18, 3  ;;  %s2478_s20 = sld [smem:[#allocation9_spill]] }
  0x28   : > { %s595_s14 = scalar_lea.vmem %s2473_s0, %s1616_s22  ;;  %s1647_s13 = sshll.u32 %s2167_s30, 5 }
  0x29   : > { %s2184_s29 = scalar_lea.vmem %s2474_s3, %s1647_s13  ;;  %s2193_s23 = scalar_lea.vmem %s2475_s5, %s1647_s13 }
  0x2a   : > { %s623_s0 = scalar_lea.vmem %s2431_s8, %s2167_s30  ;;  %s2210_s18 = scalar_lea.vmem %s2432_s9, %s1647_s13 }
  0x2b   : > { %s631_s11 = scalar_lea.vmem %s2433_s10, %s2167_s30  ;;  %s1650_s5 = sshll.u32 %s2167_s30, 7 }
  0x2c   : > { %s639_s25 = scalar_lea.vmem %s2435_s12, %s2167_s30  ;;  %s2224_s7 = scalar_lea.vmem %s2477_s27, %s1650_s5 }
  0x2d   : > { %p1625_p0 = scmp.ne.s32.totalorder %s2478_s20, 0 }
  0x2e   : > { %v644_v0 = vld [vmem:[%s595_s14] sm:$0xff] (!%p1625_p0)  ;;  %vm645_vm0 = vcmask (!%p1625_p0), 261120  }
  0x2f   : > { %643 = sbr.rel (%p1625_p0) target bundleno = 54 (0x36), region = 76  ;;  %646 = vst.msk [vmem:[%s2226_s26] sm:$0xff] (!%p1625_p0), %vm645_vm0, %v644_v0 }
  0x36 PF: > { %v2231_v1 = vld [vmem:[%s2226_s26] sm:$0xff]  ;;  %vm648_vm1 = vcmask 261120   ;;  %v679_v8 = vld [vmem:[%s2184_s29] sm:$0xff]  ;;  %v2011_v11 = vmov 0.0|0.0   ;;  %v682_v13 = vld [vmem:[%s2184_s29 + $0x18] sm:$0xff]  ;;  %vm2012_vm2 = vmmov 0   ;;  %s2479_s13 = scalar_lea.vmem %s2424_s1, %s2167_s30  ;;  %s2480_s14 = scalar_lea.vmem %s2425_s2, %s2167_s30 }
  0x37   : > { %v649_v2 = vsel %vm648_vm1, %v2231_v1, 0.0  ;;  %v680_v9 = vld [vmem:[%s2184_s29 + $0x8] sm:$0xff]  ;;  %v681_v10 = vld [vmem:[%s2184_s29 + $0x10] sm:$0xff]  ;;  %1779 = vmatprep.subr.bf16.mxu1 %v2011_v11  ;;  %v2013_v14 = vmov 0.0   ;;  %v1626_v20 = vld [vmem:[%s2479_s13] ss:$0 sm:$0xff]  ;;  %s2481_s19 = scalar_lea.vmem %s2427_s4, %s2167_s30  ;;  %s2482_s5 = scalar_lea.vmem %s2429_s6, %s2167_s30 }
  0x38   : > { %650 = vadd.xlane.f32.xlu0 %v649_v2  ;;  %v1780_v12 = vpack.c.bf16 %v680_v9, %v679_v8  ;;  %1699 = vmatprep.mubr.msk.f32.mxu1 %vm2012_vm2, %v2013_v14  ;;  %v1783_v15 = vpack.c.bf16 %v682_v13, %v681_v10  ;;  %v1627_v22 = vld [vmem:[%s2480_s14] ss:$0 sm:$0xff]  ;;  %s2014_s22 = smov 96   ;;  %s2015_s24 = smov 112   ;;  %vm767_vm3 = vcmask 130048   ;;  %vm843_vm4 = vcmask 64512  }
  0x39   : > { %1712 = vmatprep.subr.mxu0 %v2013_v14  ;;  %1714 = vmatprep.mubr.msk.f32.mxu0 %vm2012_vm2, %v2013_v14  ;;  %v1628_v25 = vld [vmem:[%s2481_s19] ss:$0 sm:$0xff]  ;;  %s2016_s16 = smov 80   ;;  %s2017_s15 = smov 48   ;;  %v1105_v58 = vld [vmem:[%s2193_s23 + $0x8] sm:$0xff]  ;;  %v1106_v60 = vld [vmem:[%s2193_s23 + $0x10] sm:$0xff] }
  0x3a   : > { %1781 = vmatpush3.bf16.msra.mxu1 %v1780_v12  ;;  %s2018_s21 = smov 64   ;;  %v1104_v57 = vld [vmem:[%s2193_s23] sm:$0xff]  ;;  %v1107_v61 = vld [vmem:[%s2193_s23 + $0x18] sm:$0xff]  ;;  %s2019_s20 = smov 16   ;;  %vm1101_vm5 = vcmask 261248  }
  0x3b   : > { %1782 = vmatprep.subr.bf16.mxu1 %v2011_v11  ;;  %v1786_v59 = vpack.c.bf16 %v1105_v58, %v1104_v57  ;;  %v1789_v62 = vpack.c.bf16 %v1107_v61, %v1106_v60  ;;  %s2485_s19 = sld [smem:[#allocation10_spill]]  ;;  %s2488_s23 = sld [smem:[#allocation24_spill]] }
  0x3c   : > { %s2020_s13 = smov [#allocation3]  }
  0x3d   : > { %s1919_s27 = sshll.u32 %s2020_s13, 4  ;;  %s1920_s27 = int_to_ptr.vmem [resolvable:$false] %s1919_s27 }
  0x3e   : > { %1784 = vmatpush3.bf16.msra.mxu1 %v1783_v15 }
  0x3f   : > { %1702 = vmatprep.subr.mxu1 %v2013_v14 }
  0xc5   : > { %v651_v3 = vpop.xlane.xlu0 %650 }
  0xc6   : > { %v653_v4 = vmul.f32 0.03125, %v651_v3 }
  0xc8   : > { %v654_v5 = vsub.f32 %v2231_v1, %v653_v4 }
  0xca   : > { %v655_v6 = vmul.f32 %v654_v5, %v654_v5 }
  0xcc   : > { %v656_v7 = vsel %vm648_vm1, %v655_v6, 0.0  ;;  %v1636_v6 = vld [vmem:[%s2482_s5] ss:$0 sm:$0xff] }
  0xcd   : > { %657 = vadd.xlane.f32.xlu0 %v656_v7 }
 0x15a   : > { %v658_v16 = vpop.xlane.xlu0 %657 }
 0x15b   : > { %v659_v17 = vmul.f32 0.03125, %v658_v16 }
 0x15d   : > { %v660_v18 = vadd.f32 1e-12, %v659_v17 }
 0x15f   : > { %1901 = vrsqrt.f32 %v660_v18  ;;  %v1218_v18 = vld [vmem:[%s2210_s18] sm:$0xff] }
 0x169   : > { %v1902_v19 = vpop.eup %1901 }
 0x16a   : > { %v662_v21 = vmul.f32 %v1902_v19, %v654_v5  ;;  %v1219_v19 = vld [vmem:[%s2210_s18 + $0x8] sm:$0xff] }
 0x16c   : > { %v670_v23 = vmul.f32 %v1626_v20, %v662_v21  ;;  %v1792_v20 = vpack.c.bf16 %v1219_v19, %v1218_v18  ;;  %v1221_v21 = vld [vmem:[%s2210_s18 + $0x18] sm:$0xff] }
 0x16e   : > { %v678_v24 = vadd.f32 %v1627_v22, %v670_v23  ;;  %v1311_v23 = vld [vmem:[%s2224_s7] sm:$0xff] }
 0x170   : > { %1700 = vmatmul.mubr.msk.f32.vlgmr.msra.gmra.mrb[0].mxu1 %vm648_vm1, %v678_v24  ;;  %v1312_v24 = vld [vmem:[%s2224_s7 + $0x8] sm:$0xff] }
 0x171   : > { %1704 = vmatprep.mubr.msk.f32.mxu1 %vm2012_vm2, %v2013_v14 }
 0x243   : > { %v759_v26 = vpop.f32.mrb[0].mxu1 }
 0x244   : > { %v760_v27 = vadd.f32 %v1628_v25, %v759_v26  ;;  %v1701_v28 = vpop.f32.mrb[1].mxu1  ;;  %v1798_v25 = vpack.c.bf16 %v1312_v24, %v1311_v23 }
 0x246   : > { %765 = vrot.lane.b32.xlu1 %v760_v27, %s2014_s22  ;;  %v763_v29 = vmul.f32 0.25, %v760_v27 }
 0x248   : > { %932 = vrot.lane.b32.xlu0 %v763_v29, %s2015_s24 }
 0x24a   : > { %934 = vrot.lane.b32.xlu1 %v760_v27, %s2016_s16  ;;  %s1644_s16 = sshll.u32 %s2485_s19, 7 }
 0x24b   : > { %s2366_s3 = scalar_lea.hbm %s2488_s23, %s1644_s16 }
 0x2b8   : > { %v766_v30 = vpop.permute.xlu1 %765 }
 0x2b9   : > { %1703 = vmatpush3.xpose.msk.msra.mxu1 %vm767_vm3, %v766_v30 }
 0x2ba   : > { %1707 = vmatprep.subr.mxu1 %v2013_v14  ;;  %v933_v32 = vpop.permute.xlu0 %932 }
 0x2bc   : > { %v935_v31 = vpop.permute.xlu1 %934  ;;  %1705 = vmatmul.mubr.msk.f32.vlgmr.msra.gmra.mrb[2].mxu1 %vm767_vm3, %v763_v29 }
 0x2bd   : > { %1713 = vmatpush3.xpose.msk.msra.mxu0 %vm767_vm3, %v935_v31  ;;  %1709 = vmatprep.mubr.msk.f32.mxu1 %vm2012_vm2, %v2013_v14 }
 0x2be   : > { %1797 = vmatprep.subr.bf16.mxu0 %v2011_v11 }
 0x2c0   : > { %1715 = vmatmul.mubr.msk.f32.vlgmr.msra.gmra.mrb[0].mxu0 %vm767_vm3, %v933_v32  ;;  %v1639_v32 = vld [vmem:[%s623_s0] ss:$0 sm:$0xff] }
 0x2c1   : > { %1776 = vmatprep.mubr.msk.f32.mxu0 %vm2012_vm2, %v2013_v14  ;;  %1799 = vmatpush3.bf16.msra.mxu0 %v1798_v25 }
 0x2c2   : > { %1800 = vmatprep.subr.bf16.mxu0 %v2011_v11 }
 0x38f   : > { %v839_v33 = vpop.f32.mrb[2].mxu1 }
 0x390   : > { %v1706_v34 = vpop.f32.mrb[3].mxu1  ;;  %v844_v35 = vsel %vm843_vm4, %v839_v33, -inf }
 0x391   : > { %845 = vmax.xlane.f32.xlu1 %v844_v35  ;;  %v1313_v35 = vld [vmem:[%s2224_s7 + $0x10] sm:$0xff] }
 0x393   : > { %v1006_v36 = vpop.f32.mrb[0].mxu0 }
 0x394   : > { %v1716_v37 = vpop.f32.mrb[1].mxu0  ;;  %v1010_v38 = vsel %vm843_vm4, %v1006_v36, -inf }
 0x395   : > { %1011 = vmax.xlane.f32.xlu0 %v1010_v38  ;;  %v1315_v38 = vld [vmem:[%s2224_s7 + $0x20] sm:$0xff] }
 0x3ab   : > { %1021 = vrot.lane.b32.xlu0 %v760_v27, %s2017_s15  ;;  %s1420_s15 = sshll.u32 %s2226_s26, 4  ;;  %s2368_s15 = int_to_ptr.vmem [resolvable:$true] %s1420_s15 }
 0x3ac   : > { %s1915_s5 = scalar_lea.vmem %s2368_s15, 128  ;;  %p1922_p5 = scmp.lt.s32.totalorder %s2368_s15, %s1920_s27 }
 0x3ad   : > { %p1916_p1 = scmp.ne.s32.totalorder %s2368_s15, %s1915_s5 }
 0x3af   : > { %p1917_p2 = pnand %p1916_p1, %p2140_p3 }
 0x3b1   : > { %p1918_p4 = pneg %p1917_p2 }
 0x41e   : > { %v846_v39 = vpop.xlane.xlu1 %845 }
 0x41f   : > { %v847_v40 = vsub.f32 %v839_v33, %v846_v39  ;;  %v1316_v39 = vld [vmem:[%s2224_s7 + $0x28] sm:$0xff] }
 0x421   : > { %v848_v41 = vmul.f32 1.442695, %v847_v40  ;;  %v1804_v40 = vpack.c.bf16 %v1316_v39, %v1315_v38 }
 0x422   : > { %v1012_v42 = vpop.xlane.xlu0 %1011 }
 0x423   : > { %1903 = vpow2.f32 %v848_v41  ;;  %v1013_v43 = vsub.f32 %v1006_v36, %v1012_v42  ;;  %v1314_v36 = vld [vmem:[%s2224_s7 + $0x18] sm:$0xff]  ;;  %v1317_v41 = vld [vmem:[%s2224_s7 + $0x30] sm:$0xff] }
 0x424   : > { %v1801_v37 = vpack.c.bf16 %v1314_v36, %v1313_v35  ;;  %v1318_v42 = vld [vmem:[%s2224_s7 + $0x38] sm:$0xff] }
 0x425   : > { %v1014_v44 = vmul.f32 1.442695, %v1013_v43  ;;  %v1807_v43 = vpack.c.bf16 %v1318_v42, %v1317_v41 }
 0x426   : > { %v1022_v54 = vpop.permute.xlu0 %1021  ;;  %1802 = vmatpush3.bf16.msra.mxu0 %v1801_v37 }
 0x427   : > { %1905 = vpow2.f32 %v1014_v44  ;;  %1803 = vmatprep.subr.bf16.mxu0 %v2011_v11  ;;  %v1319_v44 = vld [vmem:[%s2224_s7 + $0x40] sm:$0xff] }
 0x42a   : > { %1805 = vmatpush3.bf16.msra.mxu0 %v1804_v40 }
 0x42b   : > { %1806 = vmatprep.subr.bf16.mxu0 %v2011_v11 }
 0x42d   : > { %v1904_v45 = vpop.eup %1903 }
 0x42e   : > { %v850_v46 = vsel %vm843_vm4, %v1904_v45, 0.0  ;;  %1808 = vmatpush3.bf16.msra.mxu0 %v1807_v43 }
 0x42f   : > { %851 = vadd.xlane.f32.xlu1 %v850_v46  ;;  %1809 = vmatprep.subr.bf16.mxu0 %v2011_v11  ;;  %v1321_v46 = vld [vmem:[%s2224_s7 + $0x50] sm:$0xff] }
 0x431   : > { %v1906_v47 = vpop.eup %1905 }
 0x432   : > { %v1016_v48 = vsel %vm843_vm4, %v1906_v47, 0.0 }
 0x433   : > { %1017 = vadd.xlane.f32.xlu1 %v1016_v48  ;;  %v1322_v48 = vld [vmem:[%s2224_s7 + $0x58] sm:$0xff] }
 0x444   : > { %855 = vrot.lane.b32.xlu1 %v760_v27, %s2018_s21 }
 0x4bc   : > { %v852_v49 = vpop.xlane.xlu1 %851 }
 0x4bd   : > { %1907 = vrcp.f32 %v852_v49  ;;  %v1813_v49 = vpack.c.bf16 %v1322_v48, %v1321_v46 }
 0x4c0   : > { %v1018_v50 = vpop.xlane.xlu1 %1017 }
 0x4c1   : > { %1909 = vrcp.f32 %v1018_v50  ;;  %v1323_v50 = vld [vmem:[%s2224_s7 + $0x60] sm:$0xff] }
 0x4c4   : > { %v856_v51 = vpop.permute.xlu1 %855 }
 0x4c5   : > { %1708 = vmatpush3.msra.mxu1 %v856_v51  ;;  %v1324_v51 = vld [vmem:[%s2224_s7 + $0x68] sm:$0xff] }
 0x4c6   : > { %1717 = vmatprep.subr.mxu1 %v2013_v14 }
 0x4c7   : > { %v1908_v52 = vpop.eup %1907 }
 0x4c8   : > { %v854_v53 = vmul.f32 %v1908_v52, %v1904_v45  ;;  %v1320_v45 = vld [vmem:[%s2224_s7 + $0x48] sm:$0xff]  ;;  %v1816_v52 = vpack.c.bf16 %v1324_v51, %v1323_v50 }
 0x4ca   : > { %1710 = vmatmul.mubr.msk.f32.vlgmr.msra.gmra.mrb[4].mxu1 %vm843_vm4, %v854_v53  ;;  %v1325_v53 = vld [vmem:[%s2224_s7 + $0x70] sm:$0xff] }
 0x4cb   : > { %v1910_v55 = vpop.eup %1909  ;;  %1718 = vmatpush3.msra.mxu1 %v1022_v54  ;;  %1719 = vmatprep.mubr.msk.f32.mxu1 %vm2012_vm2, %v2013_v14  ;;  %v1326_v54 = vld [vmem:[%s2224_s7 + $0x78] sm:$0xff]  ;;  %s2486_s7 = sld [smem:[#allocation7_spill]] }
 0x4cc   : > { %v1020_v56 = vmul.f32 %v1910_v55, %v1906_v47  ;;  %1785 = vmatprep.subr.bf16.mxu1 %v2011_v11  ;;  %v1810_v47 = vpack.c.bf16 %v1320_v45, %v1319_v44  ;;  %v1819_v55 = vpack.c.bf16 %v1326_v54, %v1325_v53 }
 0x4ce   : > { %1720 = vmatmul.mubr.msk.f32.vlgmr.msra.gmra.mrb[6].mxu1 %vm843_vm4, %v1020_v56  ;;  %1811 = vmatpush3.bf16.msra.mxu0 %v1810_v47  ;;  %v1640_v56 = vld [vmem:[%s631_s11] ss:$0 sm:$0xff] }
 0x4cf   : > { %1730 = vmatprep.mubr.msk.f32.mxu1 %vm2012_vm2, %v2013_v14  ;;  %1787 = vmatpush3.bf16.msra.mxu1 %v1786_v59 }
 0x4d0   : > { %1788 = vmatprep.subr.bf16.mxu1 %v2011_v11  ;;  %1812 = vmatprep.subr.bf16.mxu0 %v2011_v11 }
 0x4d2   : > { %1814 = vmatpush3.bf16.msra.mxu0 %v1813_v49 }
 0x4d3   : > { %1790 = vmatpush3.bf16.msra.mxu1 %v1789_v62  ;;  %1815 = vmatprep.subr.bf16.mxu0 %v2011_v11 }
 0x4d4   : > { %1791 = vmatprep.subr.bf16.mxu1 %v2011_v11 }
 0x4d6   : > { %1817 = vmatpush3.bf16.msra.mxu0 %v1816_v52 }
 0x4d7   : > { %1818 = vmatprep.subr.bf16.mxu0 %v2011_v11 }
 0x4da   : > { %1820 = vmatpush3.bf16.msra.mxu0 %v1819_v55 }
 0x59d   : > { %v927_v63 = vpop.f32.mrb[4].mxu1 }
 0x59e   : > { %931 = vst.msk [vmem:[#allocation2] sm:$0xff] %vm767_vm3, %v927_v63  ;;  %v1711_v0 = vpop.f32.mrb[5].mxu1 }
 0x5a1   : > { %v1093_v2 = vpop.f32.mrb[6].mxu1 }
 0x5a2   : > { %1098 = vrot.lane.b32.xlu1 %v1093_v2, %s2019_s20  ;;  %v1721_v3 = vpop.f32.mrb[7].mxu1 }
 0x614   : > { %v1099_v4 = vpop.permute.xlu1 %1098 }
 0x615   : > { %1102 = vst.msk [vmem:[#allocation2] sm:$0xff] %vm1101_vm5, %v1099_v4 }
 0x61c   : > { %v1103_v5 = vld [vmem:[#allocation2] sm:$0xff] }
 0x61d   : > { %1731 = vmatmul.mubr.msk.f32.vlgmr.msra.gmra.mrb[8].mxu1 %vm648_vm1, %v1103_v5  ;;  %v1642_v5 = vld [vmem:[%s639_s25] ss:$0 sm:$0xff] }
 0x61e   : > { %1741 = vmatprep.mubr.msk.f32.mxu1 %vm2012_vm2, %v2013_v14  ;;  %1793 = vmatpush3.bf16.msra.mxu1 %v1792_v20 }
 0x61f   : > { %1794 = vmatprep.subr.bf16.mxu1 %v2011_v11 }
 0x6f0   : > { %v1184_v7 = vpop.f32.mrb[8].mxu1 }
 0x6f1   : > { %v1185_v8 = vadd.f32 %v1636_v6, %v1184_v7  ;;  %v1732_v9 = vpop.f32.mrb[9].mxu1 }
 0x6f3   : > { %v2305_v10 = vadd.f32 %v1185_v8, %v2231_v1  ;;  %v1220_v1 = vld [vmem:[%s2210_s18 + $0x10] sm:$0xff]  ;;  %s2483_s18 = sld [smem:[#allocation22_spill]] }
 0x6f4   : > { %v1795_v22 = vpack.c.bf16 %v1221_v21, %v1220_v1 }
 0x6f5   : > { %v1189_v12 = vsel %vm648_vm1, %v2305_v10, 0.0 }
 0x6f6   : > { %1190 = vadd.xlane.f32.xlu1 %v1189_v12  ;;  %1796 = vmatpush3.bf16.msra.mxu1 %v1795_v22 }
 0x6f9   : > { %s2484_s29 = scalar_lea.vmem %s2483_s18, %s2167_s30  ;;  %s2489_s30 = sand.u32 1, %s2486_s7  }
 0x6fa   : > { %v1638_v30 = vld [vmem:[%s2484_s29] ss:$0 sm:$0xff]  ;;  %s1407_s25 = scalar_lea.sflag [#allocation4], %s2489_s30  ;;  %s1921_s18 = scalar_lea.vmem %s1920_s27, 256 }
 0x6fb   : > { %p1923_p6 = scmp.lt.s32.totalorder %s1921_s18, %s1915_s5 }
 0x6fd   : > { %p1924_p7 = por %p1923_p6, %p1922_p5 }
 0x6ff   : > { %p1925_p8 = pnand %p1924_p7, %p1918_p4 }
 0x783   : > { %v1191_v13 = vpop.xlane.xlu1 %1190 }
 0x784   : > { %v1192_v14 = vmul.f32 0.03125, %v1191_v13 }
 0x786   : > { %v1193_v15 = vsub.f32 %v2305_v10, %v1192_v14 }
 0x788   : > { %v1194_v16 = vmul.f32 %v1193_v15, %v1193_v15 }
 0x78a   : > { %v1195_v17 = vsel %vm648_vm1, %v1194_v16, 0.0 }
 0x78b   : > { %1196 = vadd.xlane.f32.xlu0 %v1195_v17 }
 0x818   : > { %v1197_v26 = vpop.xlane.xlu0 %1196 }
 0x819   : > { %v1198_v27 = vmul.f32 0.03125, %v1197_v26 }
 0x81b   : > { %v1199_v28 = vadd.f32 1e-12, %v1198_v27 }
 0x81d   : > { %1911 = vrsqrt.f32 %v1199_v28 }
 0x827   : > { %v1912_v29 = vpop.eup %1911 }
 0x828   : > { %v1201_v31 = vmul.f32 %v1912_v29, %v1193_v15 }
 0x82a   : > { %v1209_v33 = vmul.f32 %v1638_v30, %v1201_v31 }
 0x82c   : > { %v1217_v34 = vadd.f32 %v1639_v32, %v1209_v33 }
 0x82e   : > { %1742 = vmatmul.mubr.msk.f32.vlgmr.msra.gmra.mrb[10].mxu1 %vm648_vm1, %v1217_v34 }
 0x901   : > { %v1298_v57 = vpop.f32.mrb[10].mxu1 }
 0x902   : > { %v1299_v58 = vadd.f32 %v1640_v56, %v1298_v57  ;;  %v1743_v59 = vpop.f32.mrb[11].mxu1 }
 0x904   : > { %v1302_v60 = vmul.f32 %v1299_v58, %v1299_v58 }
 0x906   : > { %v1303_v61 = vmul.f32 %v1302_v60, %v1299_v58 }
 0x908   : > { %v1304_v62 = vmul.f32 0.044715, %v1303_v61 }
 0x90a   : > { %v1305_v63 = vadd.f32 %v1304_v62, %v1299_v58 }
 0x90c   : > { %v1306_v0 = vmul.f32 0.7978846, %v1305_v63 }
 0x90e   : > { %1913 = vtanh.f32 %v1306_v0 }
 0x918   : > { %v1914_v11 = vpop.eup %1913 }
 0x919   : > { %v1308_v2 = vadd.f32 1.0, %v1914_v11 }
 0x91b   : > { %v1309_v3 = vmul.f32 0.5, %v1308_v2 }
 0x91d   : > { %v1310_v4 = vmul.f32 %v1309_v3, %v1299_v58 }
 0x91f   : > { %1777 = vmatmul.mubr.f32.vlgmr.msra.gmra.mrb[2].mxu0 %v1310_v4 }
 0x9f2   : > { %v1400_v6 = vpop.f32.mrb[2].mxu0 }
 0x9f3   : > { %v1401_v7 = vadd.f32 %v1642_v5, %v1400_v6  ;;  %v1778_v8 = vpop.f32.mrb[3].mxu0 }
 0x9f5   : > { %v1404_v9 = vadd.f32 %v1401_v7, %v2305_v10 }
 0x9f7   : > { %1405 = vst.msk [vmem:[%s2226_s26] sm:$0xff] %vm648_vm1, %v1404_v9 }
 0x9f8   : > { %1928 = shalt.err (!%p1925_p8)
}
 0x9f9   : > { %s1929_s26 = scalar_lea.hbm %s2366_s3, 128  ;;  %s1933_s17 = scalar_lea.hbm %s2488_s23, 256 }
 0x9fa   : > { %p1930_p10 = scmp.ne.s32.totalorder %s2366_s3, %s1929_s26  ;;  %p1934_p13 = scmp.lt.u32.totalorder %s2366_s3, %s2488_s23 }
 0x9fb   : > { %p1935_p0 = scmp.lt.u32.totalorder %s1933_s17, %s1929_s26  ;;  %p1937_p2 = scmp.lt.u32.totalorder %s1929_s26, %s2366_s3 }
 0x9fc   : > { %p1931_p11 = pnand %p1930_p10, %p2140_p3 }
 0x9fd   : > { %p1936_p1 = por %p1935_p0, %p1934_p13 }
 0x9fe   : > { %p1932_p12 = pneg %p1931_p11 }
 0x9ff   : > { %p1938_p4 = por %p1937_p2, %p1936_p1 }
 0xa01   : > { %p1939_p5 = pnand %p1938_p4, %p1932_p12 }
 0xa03   : > { %1942 = shalt.err (!%p1939_p5)
}
 0xa04   : > { %1821 = dma.vmem_to_hbm [thread:$0]  (%p2140_p3), %s2368_s15, 128, %s2366_s3, %s1407_s25  }
 0xa05 PF: > { %s2490_s19 = sld [smem:[#allocation13_spill]]  ;;  %s2491_s7 = sld [smem:[#allocation6_spill]] }
 0xa0b   : > { %p1827_p6 = scmp.ge.s32.totalorder %s2490_s19, 2  ;;  %s1432_s24 = sand.u32 1, %s2491_s7  }
 0xa0c   : > { %s1433_s16 = scalar_lea.sflag [#allocation4], %s1432_s24 }
 0xa0d   : > { %p1824_p7 = pnand %p1827_p6, %p2150_p9 }
 0xa0f   : > { %1976 = dma.done.wait (!%p1824_p7), %s1433_s16, 128  }
 0xa10   : > { %1978 = vsyncadd (!%p1824_p7), %s1433_s16, 4294967168  ;;  %s26_s15 = sadd.s32 1, %s2490_s19   ;;  %s2493_s25 = sld [smem:[#allocation7_spill]] }
 0xa11   : > { %p23_p8 = scmp.ge.s32.totalorder %s26_s15, 6   ;;  %s2494_s26 = sld [smem:[#allocation8_spill]] }
 0xa12   : > { %s2495_s27 = sld [smem:[#allocation18_spill]]  ;;  %s2496_s28 = sld [smem:[#allocation11_spill]] }
 0xa13   : > { %s2497_s29 = sld [smem:[#allocation12_spill]]  ;;  %s2498_s30 = sld [smem:[#allocation14_spill]] }
 0xa14   : > { %s2499_s14 = sld [smem:[#allocation16_spill]]  ;;  %25 = sbr.rel (!%p23_p8) target bundleno = 12 (0xc), region = 147 }
 0xa1b   :  { %1438 = vsyncpa [#allocation4], 1 }
 0xa1c   :  { %1440 = vsyncpa [#allocation4 + $0x1], 1 }

</bundles_post_ra>
